<compile_context>
chip_gen: v6e
topology: v6e:2x2x1
jax: 0.10.0
libtpu: 0.0.40
codegen_flags: <defaults>
</compile_context>

<pallas_src>
import functools

import jax
import jax.numpy as jnp
from jax.experimental import pallas as pl
from jax.experimental.pallas import tpu as pltpu


def _round_up(x: int, m: int) -> int:
    return (x + m - 1) // m * m


def _actor_kernel(scale_ref, s_ref, w1_ref, b1_ref, w2_ref, b2_ref,
                  w3_ref, b3_ref, o_ref, *, use_bf16: bool):
    cdt = jnp.bfloat16 if use_bf16 else jnp.float32
    x = s_ref[...].astype(cdt)

    h1 = jnp.dot(x, w1_ref[...].astype(cdt),
                 preferred_element_type=jnp.float32) + b1_ref[...]
    h1 = jnp.maximum(h1, 0.0)

    h2 = jnp.dot(h1.astype(cdt), w2_ref[...].astype(cdt),
                 preferred_element_type=jnp.float32) + b2_ref[...]
    h2 = jnp.maximum(h2, 0.0)

    a = jnp.dot(h2.astype(cdt), w3_ref[...].astype(cdt),
                preferred_element_type=jnp.float32) + b3_ref[...]
    a = jnp.tanh(a)                      # EUP slot -> effectively free
    o_ref[...] = (a * scale_ref[0, 0]).astype(o_ref.dtype)


def actor_forward(s, params, scale, *, tile_b: int = 512, use_bf16: bool = False):
    """params = (w1, b1, w2, b2, w3, b3); wi: (in, out), bi: (1, out)."""
    w1, b1, w2, b2, w3, b3 = params
    batch, obs = s.shape
    h1, h2, act = w1.shape[1], w2.shape[1], w3.shape[1]

    # Lane-dense padding of every feature dim to a multiple of 128.
    obs_p, h1_p, h2_p, act_p = (_round_up(d, 128) for d in (obs, h1, h2, act))

    def pad2(a, rows, cols):
        return jnp.pad(a, ((0, rows - a.shape[0]), (0, cols - a.shape[1])))

    w1p, b1p = pad2(w1, obs_p, h1_p), pad2(b1, 1, h1_p)
    w2p, b2p = pad2(w2, h1_p, h2_p), pad2(b2, 1, h2_p)
    w3p, b3p = pad2(w3, h2_p, act_p), pad2(b3, 1, act_p)

    # Batch tile: multiple of 8 sublanes, no larger than the (rounded) batch.
    tile_b = _round_up(max(8, min(tile_b, _round_up(batch, 8))), 8)
    batch_p = _round_up(batch, tile_b)
    s_p = jnp.pad(s, ((0, batch_p - batch), (0, obs_p - obs)))

    scale_arr = jnp.asarray(scale, jnp.float32).reshape(1, 1)
    grid = (batch_p // tile_b,)

    # Conservative VMEM budget: double-buffered IO tiles + resident weights +
    # f32 intermediates, with headroom, capped at 64 MiB (valid on v7x too).
    itm = 4
    io_bytes = 2 * tile_b * (obs_p + act_p) * itm
    w_bytes = (obs_p * h1_p + h1_p * h2_p + h2_p * act_p
               + h1_p + h2_p + act_p) * itm
    interm_bytes = tile_b * (h1_p + h2_p + 2 * act_p) * itm
    vmem_limit = min(2 * (io_bytes + w_bytes + interm_bytes) + (8 << 20), 64 << 20)

    smem = pl.BlockSpec(memory_space=pltpu.MemorySpace.SMEM)
    resident = lambda shape: pl.BlockSpec(shape, lambda i: (0, 0))

    out_p = pl.pallas_call(
        functools.partial(_actor_kernel, use_bf16=use_bf16),
        out_shape=jax.ShapeDtypeStruct((batch_p, act_p), jnp.float32),
        grid=grid,
        in_specs=[
            smem,                                             # scale (SMEM scalar)
            pl.BlockSpec((tile_b, obs_p), lambda i: (i, 0)),  # batch-tiled obs
            resident((obs_p, h1_p)), resident((1, h1_p)),     # layer 1 (resident)
            resident((h1_p, h2_p)), resident((1, h2_p)),      # layer 2 (resident)
            resident((h2_p, act_p)), resident((1, act_p)),    # layer 3 (resident)
        ],
        out_specs=pl.BlockSpec((tile_b, act_p), lambda i: (i, 0)),
        compiler_params=pltpu.CompilerParams(
            dimension_semantics=("parallel",),
            vmem_limit_bytes=vmem_limit),
    )(scale_arr, s_p, w1p, b1p, w2p, b2p, w3p, b3p)

    return out_p[:batch, :act]


def init_actor_params(key, obs_size, hidden_1, hidden_2, act_size):
    """Deterministic init mimicking torch.nn.Linear (uniform +-1/sqrt(fan_in))."""
    keys = jax.random.split(key, 6)

    def linear(kw, kb, fan_in, fan_out):
        bound = 1.0 / jnp.sqrt(jnp.float32(fan_in))
        w = jax.random.uniform(kw, (fan_in, fan_out), jnp.float32, -bound, bound)
        b = jax.random.uniform(kb, (1, fan_out), jnp.float32, -bound, bound)
        return w, b

    w1, b1 = linear(keys[0], keys[1], obs_size, hidden_1)
    w2, b2 = linear(keys[2], keys[3], hidden_1, hidden_2)
    w3, b3 = linear(keys[4], keys[5], hidden_2, act_size)
    return (w1, b1, w2, b2, w3, b3)


def _reference_forward(s, params, scale):
    w1, b1, w2, b2, w3, b3 = params
    h1 = jnp.maximum(s @ w1 + b1, 0.0)
    h2 = jnp.maximum(h1 @ w2 + b2, 0.0)
    return jnp.tanh(h2 @ w3 + b3) * scale


if __name__ == "__main__":
    obs_size, act_size = 16, 8
    hidden_1, hidden_2 = 32, 32
    batch = 8
    scale = 2.0

    key = jax.random.PRNGKey(0)
    k_params, k_obs = jax.random.split(key)

    params = init_actor_params(k_params, obs_size, hidden_1, hidden_2, act_size)
    s = jax.random.normal(k_obs, (batch, obs_size), jnp.float32)

    ref = _reference_forward(s, params, scale)

    # f32 path (exact vs reference; padding with zeros does not change values).
    out = jax.block_until_ready(actor_forward(s, params, scale))
    assert out.shape == (batch, act_size)
    assert jnp.allclose(out, ref, atol=1e-5, rtol=1e-5)

    # bf16 MXU path (v6e/v7x): looser tolerance.
    out_bf16 = jax.block_until_ready(actor_forward(s, params, scale, use_bf16=True))
    assert out_bf16.shape == (batch, act_size)
    assert jnp.allclose(out_bf16, ref, atol=1e-1, rtol=1e-1)

    print("KERNEL_OK")
</pallas_src>

<mosaic_0001>
module attributes {stable_mosaic.version = 11 : i64} {
  func.func @_actor_kernel(%arg0: i32, %arg1: memref<1x1xf32, #tpu.memory_space<smem>>, %arg2: memref<8x128xf32, #tpu.memory_space<vmem>>, %arg3: memref<128x128xf32, #tpu.memory_space<vmem>>, %arg4: memref<1x128xf32, #tpu.memory_space<vmem>>, %arg5: memref<128x128xf32, #tpu.memory_space<vmem>>, %arg6: memref<1x128xf32, #tpu.memory_space<vmem>>, %arg7: memref<128x128xf32, #tpu.memory_space<vmem>>, %arg8: memref<1x128xf32, #tpu.memory_space<vmem>>, %arg9: memref<8x128xf32, #tpu.memory_space<vmem>>) attributes {dimension_semantics = [#tpu.dimension_semantics<parallel>], iteration_bounds = array<i64: 1>, scalar_prefetch = 0 : i64, scratch_operands = 0 : i64, tpu.core_type = #tpu.core_type<tc>, window_params = [{transform_indices = @transform_0, window_bounds = array<i64: 1, 1>}, {transform_indices = @transform_1, window_bounds = array<i64: 8, 128>}, {pipeline_mode = #tpu.pipeline_mode<synchronous>, transform_indices = @transform_2, window_bounds = array<i64: 128, 128>}, {pipeline_mode = #tpu.pipeline_mode<synchronous>, transform_indices = @transform_3, window_bounds = array<i64: 1, 128>}, {pipeline_mode = #tpu.pipeline_mode<synchronous>, transform_indices = @transform_4, window_bounds = array<i64: 128, 128>}, {pipeline_mode = #tpu.pipeline_mode<synchronous>, transform_indices = @transform_5, window_bounds = array<i64: 1, 128>}, {pipeline_mode = #tpu.pipeline_mode<synchronous>, transform_indices = @transform_6, window_bounds = array<i64: 128, 128>}, {pipeline_mode = #tpu.pipeline_mode<synchronous>, transform_indices = @transform_7, window_bounds = array<i64: 1, 128>}, {transform_indices = @transform_8, window_bounds = array<i64: 8, 128>}]} {
    %c0 = arith.constant 0 : index
    %c0_0 = arith.constant 0 : index
    %0 = vector.load %arg2[%c0, %c0_0] : memref<8x128xf32, #tpu.memory_space<vmem>>, vector<8x128xf32>
    %c0_1 = arith.constant 0 : index
    %c0_2 = arith.constant 0 : index
    %1 = vector.load %arg3[%c0_1, %c0_2] : memref<128x128xf32, #tpu.memory_space<vmem>>, vector<128x128xf32>
    %cst = arith.constant dense<0.000000e+00> : vector<8x128xf32>
    %2 = tpu.matmul %0, %1, %cst {dimension_numbers = #tpu.dot_dimension_numbers<[1], [0], [0], [1], [0, 0, 1, 1], [], []>} : vector<8x128xf32>, vector<128x128xf32>, vector<8x128xf32> -> vector<8x128xf32>
    %c0_3 = arith.constant 0 : index
    %c0_4 = arith.constant 0 : index
    %3 = vector.load %arg4[%c0_3, %c0_4] : memref<1x128xf32, #tpu.memory_space<vmem>>, vector<1x128xf32>
    %4 = vector.broadcast %3 : vector<1x128xf32> to vector<8x128xf32>
    %5 = arith.addf %2, %4 : vector<8x128xf32>
    %cst_5 = arith.constant 0.000000e+00 : f32
    %6 = vector.broadcast %cst_5 : f32 to vector<8x128xf32>
    %7 = arith.maximumf %5, %6 : vector<8x128xf32>
    %c0_6 = arith.constant 0 : index
    %c0_7 = arith.constant 0 : index
    %8 = vector.load %arg5[%c0_6, %c0_7] : memref<128x128xf32, #tpu.memory_space<vmem>>, vector<128x128xf32>
    %cst_8 = arith.constant dense<0.000000e+00> : vector<8x128xf32>
    %9 = tpu.matmul %7, %8, %cst_8 {dimension_numbers = #tpu.dot_dimension_numbers<[1], [0], [0], [1], [0, 0, 1, 1], [], []>} : vector<8x128xf32>, vector<128x128xf32>, vector<8x128xf32> -> vector<8x128xf32>
    %c0_9 = arith.constant 0 : index
    %c0_10 = arith.constant 0 : index
    %10 = vector.load %arg6[%c0_9, %c0_10] : memref<1x128xf32, #tpu.memory_space<vmem>>, vector<1x128xf32>
    %11 = vector.broadcast %10 : vector<1x128xf32> to vector<8x128xf32>
    %12 = arith.addf %9, %11 : vector<8x128xf32>
    %cst_11 = arith.constant 0.000000e+00 : f32
    %13 = vector.broadcast %cst_11 : f32 to vector<8x128xf32>
    %14 = arith.maximumf %12, %13 : vector<8x128xf32>
    %c0_12 = arith.constant 0 : index
    %c0_13 = arith.constant 0 : index
    %15 = vector.load %arg7[%c0_12, %c0_13] : memref<128x128xf32, #tpu.memory_space<vmem>>, vector<128x128xf32>
    %cst_14 = arith.constant dense<0.000000e+00> : vector<8x128xf32>
    %16 = tpu.matmul %14, %15, %cst_14 {dimension_numbers = #tpu.dot_dimension_numbers<[1], [0], [0], [1], [0, 0, 1, 1], [], []>} : vector<8x128xf32>, vector<128x128xf32>, vector<8x128xf32> -> vector<8x128xf32>
    %c0_15 = arith.constant 0 : index
    %c0_16 = arith.constant 0 : index
    %17 = vector.load %arg8[%c0_15, %c0_16] : memref<1x128xf32, #tpu.memory_space<vmem>>, vector<1x128xf32>
    %18 = vector.broadcast %17 : vector<1x128xf32> to vector<8x128xf32>
    %19 = arith.addf %16, %18 : vector<8x128xf32>
    %20 = math.tanh %19 : vector<8x128xf32>
    %c0_17 = arith.constant 0 : index
    %c0_18 = arith.constant 0 : index
    %21 = memref.load %arg1[%c0_17, %c0_18] : memref<1x1xf32, #tpu.memory_space<smem>>
    %22 = vector.broadcast %21 : f32 to vector<8x128xf32>
    %23 = arith.mulf %20, %22 : vector<8x128xf32>
    %c0_19 = arith.constant 0 : index
    %c0_20 = arith.constant 0 : index
    %24 = vector.load %arg9[%c0_19, %c0_20] : memref<8x128xf32, #tpu.memory_space<vmem>>, vector<8x128xf32>
    tpu.vector_store %arg9[%c0_19, %c0_20], %23 {strides = array<i32>} : memref<8x128xf32, #tpu.memory_space<vmem>>, vector<8x128xf32>,
    return
  }
  func.func @transform_0(%arg0: i32) -> (i32, i32) {
    %c0_i32 = arith.constant 0 : i32
    %c0_i32_0 = arith.constant 0 : i32
    %c0_i32_1 = arith.constant 0 : i32
    return %c0_i32, %c0_i32_0 : i32, i32
  }
  func.func @transform_1(%arg0: i32) -> (i32, i32) {
    %c0_i32 = arith.constant 0 : i32
    %c0_i32_0 = arith.constant 0 : i32
    return %arg0, %c0_i32 : i32, i32
  }
  func.func @transform_2(%arg0: i32) -> (i32, i32) {
    %c0_i32 = arith.constant 0 : i32
    %c0_i32_0 = arith.constant 0 : i32
    %c0_i32_1 = arith.constant 0 : i32
    return %c0_i32, %c0_i32_0 : i32, i32
  }
  func.func @transform_3(%arg0: i32) -> (i32, i32) {
    %c0_i32 = arith.constant 0 : i32
    %c0_i32_0 = arith.constant 0 : i32
    %c0_i32_1 = arith.constant 0 : i32
    return %c0_i32, %c0_i32_0 : i32, i32
  }
  func.func @transform_4(%arg0: i32) -> (i32, i32) {
    %c0_i32 = arith.constant 0 : i32
    %c0_i32_0 = arith.constant 0 : i32
    %c0_i32_1 = arith.constant 0 : i32
    return %c0_i32, %c0_i32_0 : i32, i32
  }
  func.func @transform_5(%arg0: i32) -> (i32, i32) {
    %c0_i32 = arith.constant 0 : i32
    %c0_i32_0 = arith.constant 0 : i32
    %c0_i32_1 = arith.constant 0 : i32
    return %c0_i32, %c0_i32_0 : i32, i32
  }
  func.func @transform_6(%arg0: i32) -> (i32, i32) {
    %c0_i32 = arith.constant 0 : i32
    %c0_i32_0 = arith.constant 0 : i32
    %c0_i32_1 = arith.constant 0 : i32
    return %c0_i32, %c0_i32_0 : i32, i32
  }
  func.func @transform_7(%arg0: i32) -> (i32, i32) {
    %c0_i32 = arith.constant 0 : i32
    %c0_i32_0 = arith.constant 0 : i32
    %c0_i32_1 = arith.constant 0 : i32
    return %c0_i32, %c0_i32_0 : i32, i32
  }
  func.func @transform_8(%arg0: i32) -> (i32, i32) {
    %c0_i32 = arith.constant 0 : i32
    %c0_i32_0 = arith.constant 0 : i32
    return %arg0, %c0_i32 : i32, i32
  }
}

</mosaic_0001>

<bundles_post_ra>
// kernel: tpu_custom_call.1
= control target key start
LH: loop header
LB: loop body
LE: loop exit
PB: predicated region body
PF: predicated region fallthrough
CT: control target
= control target key end

     0   :  { %14 = vsyncpa [#allocation4], 0  ;;  %s810_s0 = inlined_call_operand.<no memory space> [shape: f32[1,1], index: 0, kind: input, shape index: {}]   ;;  %s811_s1 = inlined_call_operand.hbm [shape: f32[8,128], index: 1, kind: input, shape index: {}]   ;;  %s812_s2 = inlined_call_operand.hbm [shape: f32[128,128], index: 2, kind: input, shape index: {}]   ;;  %s813_s3 = inlined_call_operand.vmem [shape: f32[1,128], index: 3, kind: input, shape index: {}]   ;;  %s814_s4 = inlined_call_operand.hbm [shape: f32[128,128], index: 4, kind: input, shape index: {}]   ;;  %s815_s5 = inlined_call_operand.vmem [shape: f32[1,128], index: 5, kind: input, shape index: {}]   ;;  %s816_s6 = inlined_call_operand.hbm [shape: f32[128,128], index: 6, kind: input, shape index: {}]   ;;  %s817_s7 = inlined_call_operand.vmem [shape: f32[1,128], index: 7, kind: input, shape index: {}]   ;;  %s818_s8 = inlined_call_operand.hbm [shape: f32[8,128], index: 8, kind: output, shape index: {}]  }
   0x1   :  { %15 = vsyncpa [#allocation7], 0 }
   0x2   :  { %16 = vsyncpa [#allocation10], 0 }
   0x3   :  { %17 = vsyncpa [#allocation5], 0  ;;  %s666_s27 = smov [#allocation6]  }
   0x4   :  { %s35_s28 = sshll.u32 %s666_s27, 4  ;;  %s36_s28 = int_to_ptr.vmem [resolvable:$true] %s35_s28 }
   0x5   :  { %s566_s29 = scalar_lea.vmem %s36_s28, 2048  ;;  %p571_p1 = scmp.lt.s32.totalorder %s36_s28, %s36_s28 }
   0x6   :  { %p567_p0 = scmp.ne.s32.totalorder %s36_s28, %s566_s29  ;;  %p572_p2 = scmp.lt.s32.totalorder %s566_s29, %s566_s29 }
   0x8   :  { %p573_p3 = por %p572_p2, %p571_p1 }
   0xa   :  { %p574_p4 = pnand %p573_p3, %p567_p0 }
   0xc   :  { %577 = shalt.err (!%p574_p4)
}
   0xd   :  { %s667_s30 = smov 128   ;;  %s668_s9 = smov 8  }
   0xe   :  { %41 = dma.hbm_to_vmem [thread:$0]  %s812_s2, 2048, %s36_s28, [#allocation7], %s667_s30, %s667_s30, %s668_s9  }
   0xf   :  { %s669_s12 = smov [#allocation3]   ;;  %s670_s14 = smov [#allocation8]  }
  0x10   :  { %s26_s13 = sshll.u32 %s669_s12, 4  ;;  %s49_s15 = sshll.u32 %s670_s14, 4  ;;  %s27_s13 = int_to_ptr.vmem [resolvable:$true] %s26_s13  ;;  %s50_s15 = int_to_ptr.vmem [resolvable:$true] %s49_s15 }
  0x11   :  { %s586_s16 = scalar_lea.vmem %s27_s13, 128  ;;  %p591_p6 = scmp.lt.s32.totalorder %s27_s13, %s27_s13 }
  0x12   :  { %p587_p5 = scmp.ne.s32.totalorder %s27_s13, %s586_s16  ;;  %p592_p7 = scmp.lt.s32.totalorder %s586_s16, %s586_s16 }
  0x14   :  { %p593_p8 = por %p592_p7, %p591_p6 }
  0x16   :  { %p594_p9 = pnand %p593_p8, %p587_p5 }
  0x18   :  { %597 = shalt.err (!%p594_p9)
}
  0x19   :  { %29 = dma.hbm_to_vmem [thread:$0]  %s811_s1, 128, %s27_s13, [#allocation4]  }
  0x1a   :  { %s606_s19 = scalar_lea.vmem %s50_s15, 2048  ;;  %p611_p11 = scmp.lt.s32.totalorder %s50_s15, %s50_s15 }
  0x1b   :  { %p607_p10 = scmp.ne.s32.totalorder %s50_s15, %s606_s19  ;;  %p612_p12 = scmp.lt.s32.totalorder %s606_s19, %s606_s19 }
  0x1d   :  { %p613_p13 = por %p612_p12, %p611_p11 }
  0x1f   :  { %p614_p0 = pnand %p613_p13, %p607_p10 }
  0x21   :  { %617 = shalt.err (!%p614_p0)
}
  0x22   :  { %55 = dma.hbm_to_vmem [thread:$0]  %s814_s4, 2048, %s50_s15, [#allocation7], %s667_s30, %s667_s30, %s668_s9  }
  0x23   :  { %s671_s21 = smov [#allocation9]  }
  0x24   :  { %s63_s22 = sshll.u32 %s671_s21, 4  ;;  %s64_s22 = int_to_ptr.vmem [resolvable:$true] %s63_s22 }
  0x25   :  { %s626_s23 = scalar_lea.vmem %s64_s22, 2048  ;;  %p631_p2 = scmp.lt.s32.totalorder %s64_s22, %s64_s22 }
  0x26   :  { %p627_p1 = scmp.ne.s32.totalorder %s64_s22, %s626_s23  ;;  %p632_p3 = scmp.lt.s32.totalorder %s626_s23, %s626_s23 }
  0x28   :  { %p633_p4 = por %p632_p3, %p631_p2 }
  0x2a   :  { %p634_p5 = pnand %p633_p4, %p627_p1 }
  0x2c   :  { %637 = shalt.err (!%p634_p5)
}
  0x2d   :  { %69 = dma.hbm_to_vmem [thread:$0]  %s816_s6, 2048, %s64_s22, [#allocation10], %s667_s30, %s667_s30, %s668_s9  }
  0x2e   :  { %658 = dma.done.wait [#allocation4], 128  }
  0x2f   :  { %659 = vsyncadd [#allocation4], 4294967168 }
  0x30   :  { %660 = dma.done.wait [#allocation7], 4096  }
  0x31   :  { %661 = vsyncadd [#allocation7], 4294963200 }
  0x32   :  { %662 = dma.done.wait [#allocation10], 2048  }
  0x33   :  { %663 = vsyncadd [#allocation10], 4294965248  ;;  %v672_v0 = vmov 0.0   ;;  %vm673_vm0 = vmmov 0   ;;  %v100_v1 = vld [vmem:[#allocation6 + $0x78] sm:$0xff]  ;;  %v99_v2 = vld [vmem:[#allocation6 + $0x70] sm:$0xff] }
  0x34   :  { %442 = vmatprep.subr.mxu0 %v672_v0  ;;  %474 = vmatprep.mubr.msk.f32.mxu0 %vm673_vm0, %v672_v0  ;;  %v98_v3 = vld [vmem:[#allocation6 + $0x68] sm:$0xff]  ;;  %v97_v4 = vld [vmem:[#allocation6 + $0x60] sm:$0xff]  ;;  %v194_v5 = vld [vmem:[#allocation8 + $0x78] sm:$0xff]  ;;  %s674_s30 = smov [#allocation11]  }
  0x35   :  { %477 = vmatprep.subr.mxu1 %v672_v0  ;;  %509 = vmatprep.mubr.msk.f32.mxu1 %vm673_vm0, %v672_v0  ;;  %v96_v6 = vld [vmem:[#allocation6 + $0x58] sm:$0xff]  ;;  %v193_v7 = vld [vmem:[#allocation8 + $0x70] sm:$0xff]  ;;  %v192_v8 = vld [vmem:[#allocation8 + $0x68] sm:$0xff]  ;;  %s377_s9 = sshll.u32 %s674_s30, 4  ;;  %s378_s9 = int_to_ptr.vmem [resolvable:$true] %s377_s9 }
  0x36   :  { %443 = vmatpush3.msra.mxu0 %v100_v1  ;;  %478 = vmatpush3.msra.mxu1 %v194_v5  ;;  %v95_v9 = vld [vmem:[#allocation6 + $0x50] sm:$0xff]  ;;  %v191_v10 = vld [vmem:[#allocation8 + $0x60] sm:$0xff]  ;;  %v94_v11 = vld [vmem:[#allocation6 + $0x48] sm:$0xff]  ;;  %p643_p7 = scmp.lt.s32.totalorder %s378_s9, %s378_s9 }
  0x37   :  { %444 = vmatprep.subr.mxu0 %v672_v0  ;;  %479 = vmatprep.subr.mxu1 %v672_v0  ;;  %v190_v12 = vld [vmem:[#allocation8 + $0x58] sm:$0xff]  ;;  %v93_v13 = vld [vmem:[#allocation6 + $0x40] sm:$0xff]  ;;  %v189_v14 = vld [vmem:[#allocation8 + $0x50] sm:$0xff] }
  0x38   :  { %445 = vmatpush3.msra.mxu0 %v99_v2  ;;  %480 = vmatpush3.msra.mxu1 %v193_v7  ;;  %v92_v15 = vld [vmem:[#allocation6 + $0x38] sm:$0xff]  ;;  %v188_v16 = vld [vmem:[#allocation8 + $0x48] sm:$0xff]  ;;  %v91_v17 = vld [vmem:[#allocation6 + $0x30] sm:$0xff] }
  0x39   :  { %446 = vmatprep.subr.mxu0 %v672_v0  ;;  %481 = vmatprep.subr.mxu1 %v672_v0  ;;  %v187_v18 = vld [vmem:[#allocation8 + $0x40] sm:$0xff]  ;;  %v90_v19 = vld [vmem:[#allocation6 + $0x28] sm:$0xff]  ;;  %v186_v20 = vld [vmem:[#allocation8 + $0x38] sm:$0xff] }
  0x3a   :  { %447 = vmatpush3.msra.mxu0 %v98_v3  ;;  %482 = vmatpush3.msra.mxu1 %v192_v8  ;;  %v89_v21 = vld [vmem:[#allocation6 + $0x20] sm:$0xff]  ;;  %v185_v22 = vld [vmem:[#allocation8 + $0x30] sm:$0xff]  ;;  %v88_v23 = vld [vmem:[#allocation6 + $0x18] sm:$0xff] }
  0x3b   :  { %448 = vmatprep.subr.mxu0 %v672_v0  ;;  %483 = vmatprep.subr.mxu1 %v672_v0  ;;  %v184_v24 = vld [vmem:[#allocation8 + $0x28] sm:$0xff]  ;;  %v87_v25 = vld [vmem:[#allocation6 + $0x10] sm:$0xff]  ;;  %v183_v26 = vld [vmem:[#allocation8 + $0x20] sm:$0xff] }
  0x3c   :  { %449 = vmatpush3.msra.mxu0 %v97_v4  ;;  %484 = vmatpush3.msra.mxu1 %v191_v10  ;;  %v86_v27 = vld [vmem:[#allocation6 + $0x8] sm:$0xff]  ;;  %v182_v28 = vld [vmem:[#allocation8 + $0x18] sm:$0xff]  ;;  %v85_v29 = vld [vmem:[#allocation6] sm:$0xff] }
  0x3d   :  { %450 = vmatprep.subr.mxu0 %v672_v0  ;;  %485 = vmatprep.subr.mxu1 %v672_v0  ;;  %v84_v30 = vld [vmem:[#allocation3] sm:$0xff]  ;;  %v181_v31 = vld [vmem:[#allocation8 + $0x10] sm:$0xff]  ;;  %v180_v32 = vld [vmem:[#allocation8 + $0x8] sm:$0xff] }
  0x3e   :  { %451 = vmatpush3.msra.mxu0 %v96_v6  ;;  %486 = vmatpush3.msra.mxu1 %v190_v12  ;;  %v179_v33 = vld [vmem:[#allocation8] sm:$0xff]  ;;  %v288_v34 = vld [vmem:[#allocation9 + $0x78] sm:$0xff]  ;;  %v287_v35 = vld [vmem:[#allocation9 + $0x70] sm:$0xff] }
  0x3f   :  { %452 = vmatprep.subr.mxu0 %v672_v0  ;;  %487 = vmatprep.subr.mxu1 %v672_v0  ;;  %v286_v36 = vld [vmem:[#allocation9 + $0x68] sm:$0xff]  ;;  %v285_v37 = vld [vmem:[#allocation9 + $0x60] sm:$0xff]  ;;  %v284_v38 = vld [vmem:[#allocation9 + $0x58] sm:$0xff] }
  0x40   :  { %453 = vmatpush3.msra.mxu0 %v95_v9  ;;  %488 = vmatpush3.msra.mxu1 %v189_v14  ;;  %v283_v39 = vld [vmem:[#allocation9 + $0x50] sm:$0xff]  ;;  %v282_v40 = vld [vmem:[#allocation9 + $0x48] sm:$0xff]  ;;  %v281_v41 = vld [vmem:[#allocation9 + $0x40] sm:$0xff] }
  0x41   :  { %454 = vmatprep.subr.mxu0 %v672_v0  ;;  %489 = vmatprep.subr.mxu1 %v672_v0  ;;  %v280_v42 = vld [vmem:[#allocation9 + $0x38] sm:$0xff]  ;;  %v279_v43 = vld [vmem:[#allocation9 + $0x30] sm:$0xff]  ;;  %v278_v44 = vld [vmem:[#allocation9 + $0x28] sm:$0xff] }
  0x42   :  { %455 = vmatpush3.msra.mxu0 %v94_v11  ;;  %490 = vmatpush3.msra.mxu1 %v188_v16  ;;  %v277_v45 = vld [vmem:[#allocation9 + $0x20] sm:$0xff]  ;;  %v276_v46 = vld [vmem:[#allocation9 + $0x18] sm:$0xff]  ;;  %v275_v52 = vld [vmem:[#allocation9 + $0x10] sm:$0xff] }
  0x43   :  { %456 = vmatprep.subr.mxu0 %v672_v0  ;;  %491 = vmatprep.subr.mxu1 %v672_v0  ;;  %v388_v47 = vld [vmem:[%s813_s3] ss:$0 sm:$0xff]  ;;  %v274_v53 = vld [vmem:[#allocation9 + $0x8] sm:$0xff]  ;;  %v273_v54 = vld [vmem:[#allocation9] sm:$0xff] }
  0x44   :  { %457 = vmatpush3.msra.mxu0 %v93_v13  ;;  %492 = vmatpush3.msra.mxu1 %v187_v18  ;;  %v389_v55 = vld [vmem:[%s815_s5] ss:$0 sm:$0xff]  ;;  %s638_s5 = scalar_lea.vmem %s378_s9, 128 }
  0x45   :  { %458 = vmatprep.subr.mxu0 %v672_v0  ;;  %493 = vmatprep.subr.mxu1 %v672_v0  ;;  %v390_v60 = vld [vmem:[%s817_s7] ss:$0 sm:$0xff]  ;;  %p639_p6 = scmp.ne.s32.totalorder %s378_s9, %s638_s5  ;;  %p644_p8 = scmp.lt.s32.totalorder %s638_s5, %s638_s5 }
  0x46   :  { %459 = vmatpush3.msra.mxu0 %v92_v15  ;;  %494 = vmatpush3.msra.mxu1 %v186_v20 }
  0x47   :  { %460 = vmatprep.subr.mxu0 %v672_v0  ;;  %495 = vmatprep.subr.mxu1 %v672_v0  ;;  %p645_p9 = por %p644_p8, %p643_p7 }
  0x48   :  { %461 = vmatpush3.msra.mxu0 %v91_v17  ;;  %496 = vmatpush3.msra.mxu1 %v185_v22 }
  0x49   :  { %462 = vmatprep.subr.mxu0 %v672_v0  ;;  %497 = vmatprep.subr.mxu1 %v672_v0  ;;  %p646_p10 = pnand %p645_p9, %p639_p6 }
  0x4a   :  { %463 = vmatpush3.msra.mxu0 %v90_v19  ;;  %498 = vmatpush3.msra.mxu1 %v184_v24 }
  0x4b   :  { %464 = vmatprep.subr.mxu0 %v672_v0  ;;  %499 = vmatprep.subr.mxu1 %v672_v0 }
  0x4c   :  { %465 = vmatpush3.msra.mxu0 %v89_v21  ;;  %500 = vmatpush3.msra.mxu1 %v183_v26 }
  0x4d   :  { %466 = vmatprep.subr.mxu0 %v672_v0  ;;  %501 = vmatprep.subr.mxu1 %v672_v0 }
  0x4e   :  { %467 = vmatpush3.msra.mxu0 %v88_v23  ;;  %502 = vmatpush3.msra.mxu1 %v182_v28 }
  0x4f   :  { %468 = vmatprep.subr.mxu0 %v672_v0  ;;  %503 = vmatprep.subr.mxu1 %v672_v0 }
  0x50   :  { %469 = vmatpush3.msra.mxu0 %v87_v25  ;;  %504 = vmatpush3.msra.mxu1 %v181_v31 }
  0x51   :  { %470 = vmatprep.subr.mxu0 %v672_v0  ;;  %505 = vmatprep.subr.mxu1 %v672_v0 }
  0x52   :  { %471 = vmatpush3.msra.mxu0 %v86_v27  ;;  %506 = vmatpush3.msra.mxu1 %v180_v32 }
  0x53   :  { %472 = vmatprep.subr.mxu0 %v672_v0  ;;  %507 = vmatprep.subr.mxu1 %v672_v0 }
  0x54   :  { %473 = vmatpush3.msra.mxu0 %v85_v29  ;;  %508 = vmatpush3.msra.mxu1 %v179_v33 }
  0x55   :  { %475 = vmatmul.mubr.f32.vlgmr.msra.gmra.mxu0 %v84_v30  ;;  %512 = vmatprep.subr.mxu0 %v672_v0 }
  0x56   :  { %544 = vmatprep.mubr.msk.f32.mxu0 %vm673_vm0, %v672_v0  ;;  %513 = vmatpush3.msra.mxu0 %v288_v34 }
  0x57   :  { %514 = vmatprep.subr.mxu0 %v672_v0 }
  0x58   :  { %515 = vmatpush3.msra.mxu0 %v287_v35 }
  0x59   :  { %516 = vmatprep.subr.mxu0 %v672_v0 }
  0x5a   :  { %517 = vmatpush3.msra.mxu0 %v286_v36 }
  0x5b   :  { %518 = vmatprep.subr.mxu0 %v672_v0 }
  0x5c   :  { %519 = vmatpush3.msra.mxu0 %v285_v37 }
  0x5d   :  { %520 = vmatprep.subr.mxu0 %v672_v0 }
  0x5e   :  { %521 = vmatpush3.msra.mxu0 %v284_v38 }
  0x5f   :  { %522 = vmatprep.subr.mxu0 %v672_v0 }
  0x60   :  { %523 = vmatpush3.msra.mxu0 %v283_v39 }
  0x61   :  { %524 = vmatprep.subr.mxu0 %v672_v0 }
  0x62   :  { %525 = vmatpush3.msra.mxu0 %v282_v40 }
  0x63   :  { %526 = vmatprep.subr.mxu0 %v672_v0 }
  0x64   :  { %527 = vmatpush3.msra.mxu0 %v281_v41 }
  0x65   :  { %528 = vmatprep.subr.mxu0 %v672_v0 }
  0x66   :  { %529 = vmatpush3.msra.mxu0 %v280_v42 }
  0x67   :  { %530 = vmatprep.subr.mxu0 %v672_v0 }
  0x68   :  { %531 = vmatpush3.msra.mxu0 %v279_v43 }
  0x69   :  { %532 = vmatprep.subr.mxu0 %v672_v0 }
  0x6a   :  { %533 = vmatpush3.msra.mxu0 %v278_v44 }
  0x6b   :  { %534 = vmatprep.subr.mxu0 %v672_v0 }
  0x6c   :  { %535 = vmatpush3.msra.mxu0 %v277_v45 }
  0x6d   :  { %536 = vmatprep.subr.mxu0 %v672_v0 }
  0x6e   :  { %537 = vmatpush3.msra.mxu0 %v276_v46 }
  0x6f   :  { %538 = vmatprep.subr.mxu0 %v672_v0 }
  0x70   :  { %539 = vmatpush3.msra.mxu0 %v275_v52 }
  0x71   :  { %540 = vmatprep.subr.mxu0 %v672_v0 }
  0x72   :  { %541 = vmatpush3.msra.mxu0 %v274_v53 }
  0x73   :  { %542 = vmatprep.subr.mxu0 %v672_v0  ;;  %v368_v0 = vstv %s810_s0 }
  0x74   :  { %543 = vmatpush3.msra.mxu0 %v273_v54 }
 0x115   :  { %v174_v48 = vpop.f32.mrf.mxu0 }
 0x116   :  { %v175_v49 = vadd.f32 %v388_v47, %v174_v48 }
 0x117   :  { %v476_v50 = vpop.f32.mrf.mxu0 }
 0x118   :  { %v178_v51 = vmax.f32 %v175_v49, 0.0 }
 0x11a   :  { %510 = vmatmul.mubr.f32.vlgmr.msra.gmra.mxu1 %v178_v51 }
 0x1da   :  { %v268_v56 = vpop.f32.mrf.mxu1 }
 0x1db   :  { %v269_v57 = vadd.f32 %v389_v55, %v268_v56 }
 0x1dc   :  { %v511_v58 = vpop.f32.mrf.mxu1 }
 0x1dd   :  { %v272_v59 = vmax.f32 %v269_v57, 0.0 }
 0x1df   :  { %545 = vmatmul.mubr.f32.vlgmr.msra.gmra.mxu0 %v272_v59 }
 0x29f   :  { %v362_v61 = vpop.f32.mrf.mxu0 }
 0x2a0   :  { %v363_v62 = vadd.f32 %v390_v60, %v362_v61 }
 0x2a1   :  { %v546_v63 = vpop.f32.mrf.mxu0 }
 0x2a2   :  { %556 = vtanh.f32 %v363_v62 }
 0x2af   :  { %v557_v1 = vpop.eup %556 }
 0x2b0   :  { %v369_v2 = vmul.f32 %v557_v1, %v368_v0 }
 0x2b2   :  { %370 = vst [vmem:[#allocation11] sm:$0xff] %v369_v2 }
 0x2b3   :  { %649 = shalt.err (!%p646_p10)
}
 0x2b4   :  { %380 = dma.vmem_to_hbm [thread:$0]  %s378_s9, 128, %s818_s8, [#allocation5]  }
 0x2b5   :  { %664 = dma.done.wait [#allocation5], 128  }
 0x2b6   :  { %665 = vsyncadd [#allocation5], 4294967168 }
 0x2b7   :  { %384 = vsyncpa [#allocation4], 1 }
 0x2b8   :  { %385 = vsyncpa [#allocation7], 1 }
 0x2b9   :  { %386 = vsyncpa [#allocation10], 1 }
 0x2ba   :  { %387 = vsyncpa [#allocation5], 1 }

</bundles_post_ra>
